<compile_context>
chip_gen: v6e
topology: v6e:2x2x1
jax: 0.10.0
libtpu: 0.0.40
codegen_flags: <defaults>
</compile_context>

<pallas_src>
import jax
import jax.numpy as jnp
from jax.experimental import pallas as pl
from jax.experimental.pallas import tpu as pltpu


def fused_attention_kernel(x_ref, wqkv_ref, bqkv_ref, out_ref, attn_ref):
    bblk, S, D = x_ref.shape

    # ---- fused Q/K/V projection: one MXU matmul for the whole batch block ----
    x2d = x_ref[...].reshape(bblk * S, D)                      # (Bb*S, D)
    qkv = jnp.dot(x2d, wqkv_ref[...],
                  preferred_element_type=jnp.float32) + bqkv_ref[...]  # (Bb*S, 3D)

    scale = 1.0 / jnp.sqrt(jnp.float32(D))
    q = (qkv[:, 0 * D:1 * D] * scale).reshape(bblk, S, D)      # scale folded into q
    k = qkv[:, 1 * D:2 * D].reshape(bblk, S, D)
    v = qkv[:, 2 * D:3 * D].reshape(bblk, S, D)

    # ---- scores = Q @ K^T / sqrt(d): contract last axes, no explicit k.T ----
    scores = jnp.einsum("bqd,bkd->bqk", q, k,
                        preferred_element_type=jnp.float32)    # (Bb, S, S)

    # ---- numerically-stable softmax ----
    m = jnp.max(scores, axis=-1, keepdims=True)
    p = jnp.exp(scores - m)
    denom = jnp.sum(p, axis=-1, keepdims=True)
    inv = pl.reciprocal(denom, approx=True)                    # EUP slot (free-ish)
    inv = inv * (2.0 - denom * inv)                            # 1 Newton step -> ~exact
    attn = p * inv

    # ---- output = attn @ V ----
    out = jnp.einsum("bqk,bkd->bqd", attn, v,
                     preferred_element_type=jnp.float32)       # (Bb, S, D)

    out_ref[...] = out.astype(out_ref.dtype)
    attn_ref[...] = attn.astype(attn_ref.dtype)


def _pick_batch_block(B, S, target_rows=256):
    """Largest divisor of B such that B_blk*S roughly fills the MXU M dim."""
    target = max(1, -(-target_rows // S))          # ceil(target_rows / S)
    best = 1
    for d in range(1, B + 1):
        if B % d == 0 and d <= target:
            best = d
    return best


def simple_attention(x, wq, bq, wk, bk, wv, bv, *, compute_dtype=jnp.float32):
    """x: (B, S, D) float32. w*: (D, D) PyTorch layout (out, in). b*: (D,)."""
    B, S, D = x.shape

    # nn.Linear computes x @ W^T + b; pre-transpose and fuse the three weights
    # into one (D, 3D) matrix / (1, 3D) bias in plain JAX (one-time cost).
    wqkv_t = jnp.concatenate([wq.T, wk.T, wv.T], axis=1).astype(compute_dtype)
    bqkv = jnp.concatenate([bq, bk, bv]).reshape(1, 3 * D).astype(jnp.float32)
    x_in = x.astype(compute_dtype)

    B_blk = _pick_batch_block(B, S)
    grid = (B // B_blk,)

    out, attn = pl.pallas_call(
        fused_attention_kernel,
        out_shape=(
            jax.ShapeDtypeStruct((B, S, D), jnp.float32),
            jax.ShapeDtypeStruct((B, S, S), jnp.float32),
        ),
        grid_spec=pltpu.PrefetchScalarGridSpec(
            num_scalar_prefetch=0,
            grid=grid,
            in_specs=[
                pl.BlockSpec((B_blk, S, D), lambda b: (b, 0, 0)),   # x block
                pl.BlockSpec((D, 3 * D), lambda b: (0, 0)),         # fused W^T
                pl.BlockSpec((1, 3 * D), lambda b: (0, 0)),         # fused bias
            ],
            out_specs=[
                pl.BlockSpec((B_blk, S, D), lambda b: (b, 0, 0)),   # output
                pl.BlockSpec((B_blk, S, S), lambda b: (b, 0, 0)),   # attention weights
            ],
        ),
        compiler_params=pltpu.CompilerParams(
            dimension_semantics=("parallel",),       # batch-block axis shards across TCs (v7x)
            vmem_limit_bytes=32 * 1024 * 1024,       # safe on v5e/v6e/v7x
        ),
    )(x_in, wqkv_t, bqkv)
    return out, attn


def reference(x, wq, bq, wk, bk, wv, bv):
    q = x @ wq.T + bq
    k = x @ wk.T + bk
    v = x @ wv.T + bv
    d = x.shape[-1]
    scores = jnp.einsum("bsd,btd->bst", q, k) / jnp.sqrt(jnp.float32(d))
    attn = jax.nn.softmax(scores, axis=-1)
    out = jnp.einsum("bst,btd->bsd", attn, v)
    return out, attn


if __name__ == "__main__":
    B, S, D = 2, 8, 32

    key = jax.random.PRNGKey(0)
    kx, kq, kbq, kk, kbk, kv, kbv = jax.random.split(key, 7)

    x = jax.random.normal(kx, (B, S, D), dtype=jnp.float32)

    # Deterministic PyTorch-style (uniform) init for the three Linear layers.
    bound = 1.0 / (D ** 0.5)
    wq = jax.random.uniform(kq, (D, D), jnp.float32, -bound, bound)
    bq = jax.random.uniform(kbq, (D,), jnp.float32, -bound, bound)
    wk = jax.random.uniform(kk, (D, D), jnp.float32, -bound, bound)
    bk = jax.random.uniform(kbk, (D,), jnp.float32, -bound, bound)
    wv = jax.random.uniform(kv, (D, D), jnp.float32, -bound, bound)
    bv = jax.random.uniform(kbv, (D,), jnp.float32, -bound, bound)

    out, attn = simple_attention(x, wq, bq, wk, bk, wv, bv)
    out, attn = jax.block_until_ready(out), jax.block_until_ready(attn)

    out_ref, attn_ref = reference(x, wq, bq, wk, bk, wv, bv)
    assert jnp.allclose(out, out_ref, atol=1e-4, rtol=1e-4)
    assert jnp.allclose(attn, attn_ref, atol=1e-4, rtol=1e-4)
    assert out.shape == (B, S, D) and attn.shape == (B, S, S)

    print("KERNEL_OK")
</pallas_src>

<mosaic_0001>
module attributes {stable_mosaic.version = 11 : i64} {
  func.func @fused_attention_kernel(%arg0: i32, %arg1: memref<2x8x32xf32, #tpu.memory_space<vmem>>, %arg2: memref<32x96xf32, #tpu.memory_space<vmem>>, %arg3: memref<1x96xf32, #tpu.memory_space<vmem>>, %arg4: memref<2x8x32xf32, #tpu.memory_space<vmem>>, %arg5: memref<2x8x8xf32, #tpu.memory_space<vmem>>) attributes {dimension_semantics = [#tpu.dimension_semantics<parallel>], iteration_bounds = array<i64: 1>, scalar_prefetch = 0 : i64, scratch_operands = 0 : i64, tpu.core_type = #tpu.core_type<tc>, window_params = [{transform_indices = @transform_0, window_bounds = array<i64: 2, 8, 32>}, {pipeline_mode = #tpu.pipeline_mode<synchronous>, transform_indices = @transform_1, window_bounds = array<i64: 32, 96>}, {pipeline_mode = #tpu.pipeline_mode<synchronous>, transform_indices = @transform_2, window_bounds = array<i64: 1, 96>}, {transform_indices = @transform_3, window_bounds = array<i64: 2, 8, 32>}, {transform_indices = @transform_4, window_bounds = array<i64: 2, 8, 8>}]} {
    %c0 = arith.constant 0 : index
    %c0_0 = arith.constant 0 : index
    %c0_1 = arith.constant 0 : index
    %0 = vector.load %arg1[%c0, %c0_0, %c0_1] : memref<2x8x32xf32, #tpu.memory_space<vmem>>, vector<2x8x32xf32>
    %1 = vector.shape_cast %0 : vector<2x8x32xf32> to vector<16x32xf32>
    %c0_2 = arith.constant 0 : index
    %c0_3 = arith.constant 0 : index
    %2 = vector.load %arg2[%c0_2, %c0_3] : memref<32x96xf32, #tpu.memory_space<vmem>>, vector<32x96xf32>
    %cst = arith.constant dense<0.000000e+00> : vector<16x96xf32>
    %3 = tpu.matmul %1, %2, %cst {dimension_numbers = #tpu.dot_dimension_numbers<[1], [0], [0], [1], [0, 0, 1, 1], [], []>} : vector<16x32xf32>, vector<32x96xf32>, vector<16x96xf32> -> vector<16x96xf32>
    %c0_4 = arith.constant 0 : index
    %c0_5 = arith.constant 0 : index
    %4 = vector.load %arg3[%c0_4, %c0_5] : memref<1x96xf32, #tpu.memory_space<vmem>>, vector<1x96xf32>
    %5 = vector.broadcast %4 : vector<1x96xf32> to vector<16x96xf32>
    %6 = arith.addf %3, %5 : vector<16x96xf32>
    %cst_6 = arith.constant 3.200000e+01 : f32
    %7 = math.sqrt %cst_6 : f32
    %cst_7 = arith.constant 1.000000e+00 : f32
    %8 = arith.divf %cst_7, %7 : f32
    %9 = vector.extract_strided_slice %6 {offsets = [0, 0], sizes = [16, 32], strides = [1, 1]} : vector<16x96xf32> to vector<16x32xf32>
    %10 = vector.broadcast %8 : f32 to vector<16x32xf32>
    %11 = arith.mulf %9, %10 : vector<16x32xf32>
    %12 = vector.shape_cast %11 : vector<16x32xf32> to vector<2x8x32xf32>
    %13 = vector.extract_strided_slice %6 {offsets = [0, 32], sizes = [16, 32], strides = [1, 1]} : vector<16x96xf32> to vector<16x32xf32>
    %14 = vector.shape_cast %13 : vector<16x32xf32> to vector<2x8x32xf32>
    %15 = vector.extract_strided_slice %6 {offsets = [0, 64], sizes = [16, 32], strides = [1, 1]} : vector<16x96xf32> to vector<16x32xf32>
    %16 = vector.shape_cast %15 : vector<16x32xf32> to vector<2x8x32xf32>
    "tpu.trace_start"() <{level = 10 : i32, message = "bqd,bkd->bqk"}> : () -> ()
    %cst_8 = arith.constant dense<0.000000e+00> : vector<2x8x8xf32>
    %17 = tpu.matmul %12, %14, %cst_8 {dimension_numbers = #tpu.dot_dimension_numbers<[2], [2], [1], [1], [0, 0, 0, 1, 1, 1], [0], [0]>} : vector<2x8x32xf32>, vector<2x8x32xf32>, vector<2x8x8xf32> -> vector<2x8x8xf32>
    "tpu.trace_stop"() : () -> ()
    %cst_9 = arith.constant dense<0xFF800000> : vector<2x8xf32>
    %18 = vector.multi_reduction <maximumf>, %17, %cst_9 [2] : vector<2x8x8xf32> to vector<2x8xf32>
    %19 = vector.shape_cast %18 : vector<2x8xf32> to vector<2x8x1xf32>
    %20 = vector.broadcast %19 : vector<2x8x1xf32> to vector<2x8x8xf32>
    %21 = arith.subf %17, %20 : vector<2x8x8xf32>
    %22 = math.exp %21 : vector<2x8x8xf32>
    %cst_10 = arith.constant dense<0.000000e+00> : vector<2x8xf32>
    %23 = vector.multi_reduction <add>, %22, %cst_10 [2] : vector<2x8x8xf32> to vector<2x8xf32>
    %24 = vector.shape_cast %23 : vector<2x8xf32> to vector<2x8x1xf32>
    %25 = tpu.reciprocal %24 {approx = true} : vector<2x8x1xf32> -> vector<2x8x1xf32>
    %26 = arith.mulf %24, %25 : vector<2x8x1xf32>
    %cst_11 = arith.constant 2.000000e+00 : f32
    %27 = vector.broadcast %cst_11 : f32 to vector<2x8x1xf32>
    %28 = arith.subf %27, %26 : vector<2x8x1xf32>
    %29 = arith.mulf %25, %28 : vector<2x8x1xf32>
    %30 = vector.broadcast %29 : vector<2x8x1xf32> to vector<2x8x8xf32>
    %31 = arith.mulf %22, %30 : vector<2x8x8xf32>
    "tpu.trace_start"() <{level = 10 : i32, message = "bqk,bkd->bqd"}> : () -> ()
    %cst_12 = arith.constant dense<0.000000e+00> : vector<2x8x32xf32>
    %32 = tpu.matmul %31, %16, %cst_12 {dimension_numbers = #tpu.dot_dimension_numbers<[2], [1], [1], [2], [0, 0, 0, 1, 1, 2], [0], [0]>} : vector<2x8x8xf32>, vector<2x8x32xf32>, vector<2x8x32xf32> -> vector<2x8x32xf32>
    "tpu.trace_stop"() : () -> ()
    %c0_13 = arith.constant 0 : index
    %c0_14 = arith.constant 0 : index
    %c0_15 = arith.constant 0 : index
    %33 = vector.load %arg4[%c0_13, %c0_14, %c0_15] : memref<2x8x32xf32, #tpu.memory_space<vmem>>, vector<2x8x32xf32>
    tpu.vector_store %arg4[%c0_13, %c0_14, %c0_15], %32 {strides = array<i32>} : memref<2x8x32xf32, #tpu.memory_space<vmem>>, vector<2x8x32xf32>,
    %c0_16 = arith.constant 0 : index
    %c0_17 = arith.constant 0 : index
    %c0_18 = arith.constant 0 : index
    %34 = vector.load %arg5[%c0_16, %c0_17, %c0_18] : memref<2x8x8xf32, #tpu.memory_space<vmem>>, vector<2x8x8xf32>
    tpu.vector_store %arg5[%c0_16, %c0_17, %c0_18], %31 {strides = array<i32>} : memref<2x8x8xf32, #tpu.memory_space<vmem>>, vector<2x8x8xf32>,
    return
  }
  func.func @transform_0(%arg0: i32) -> (i32, i32, i32) {
    %c0_i32 = arith.constant 0 : i32
    %c0_i32_0 = arith.constant 0 : i32
    %c0_i32_1 = arith.constant 0 : i32
    return %arg0, %c0_i32, %c0_i32_0 : i32, i32, i32
  }
  func.func @transform_1(%arg0: i32) -> (i32, i32) {
    %c0_i32 = arith.constant 0 : i32
    %c0_i32_0 = arith.constant 0 : i32
    %c0_i32_1 = arith.constant 0 : i32
    return %c0_i32, %c0_i32_0 : i32, i32
  }
  func.func @transform_2(%arg0: i32) -> (i32, i32) {
    %c0_i32 = arith.constant 0 : i32
    %c0_i32_0 = arith.constant 0 : i32
    %c0_i32_1 = arith.constant 0 : i32
    return %c0_i32, %c0_i32_0 : i32, i32
  }
  func.func @transform_3(%arg0: i32) -> (i32, i32, i32) {
    %c0_i32 = arith.constant 0 : i32
    %c0_i32_0 = arith.constant 0 : i32
    %c0_i32_1 = arith.constant 0 : i32
    return %arg0, %c0_i32, %c0_i32_0 : i32, i32, i32
  }
  func.func @transform_4(%arg0: i32) -> (i32, i32, i32) {
    %c0_i32 = arith.constant 0 : i32
    %c0_i32_0 = arith.constant 0 : i32
    %c0_i32_1 = arith.constant 0 : i32
    return %arg0, %c0_i32, %c0_i32_0 : i32, i32, i32
  }
}

</mosaic_0001>

<bundles_post_ra>
// kernel: tpu_custom_call.1
= control target key start
LH: loop header
LB: loop body
LE: loop exit
PB: predicated region body
PF: predicated region fallthrough
CT: control target
= control target key end

     0   :  { %10 = vsyncpa [#allocation3], 0  ;;  %s760_s0 = inlined_call_operand.hbm [shape: f32[2,8,32], index: 0, kind: input, shape index: {}]   ;;  %s761_s1 = inlined_call_operand.hbm [shape: f32[32,96], index: 1, kind: input, shape index: {}]   ;;  %s762_s2 = inlined_call_operand.vmem [shape: f32[1,96], index: 2, kind: input, shape index: {}]   ;;  %s763_s3 = inlined_call_operand.hbm [shape: f32[2,8,32], index: 3, kind: output, shape index: {0}]   ;;  %s764_s4 = inlined_call_operand.hbm [shape: f32[2,8,8], index: 4, kind: output, shape index: {1}]  }
   0x1   :  { %11 = vsyncpa [#allocation6], 0 }
   0x2   :  { %12 = vsyncpa [#allocation4], 0 }
   0x3   :  { %13 = vsyncpa [#allocation9], 0  ;;  %s678_s15 = smov [#allocation2]  }
   0x4   :  { %s19_s16 = sshll.u32 %s678_s15, 4  ;;  %s20_s16 = int_to_ptr.vmem [resolvable:$true] %s19_s16 }
   0x5   :  { %s598_s17 = scalar_lea.vmem %s20_s16, 256  ;;  %p603_p1 = scmp.lt.s32.totalorder %s20_s16, %s20_s16 }
   0x6   :  { %p599_p0 = scmp.ne.s32.totalorder %s20_s16, %s598_s17  ;;  %p604_p2 = scmp.lt.s32.totalorder %s598_s17, %s598_s17 }
   0x8   :  { %p605_p3 = por %p604_p2, %p603_p1 }
   0xa   :  { %p606_p4 = pnand %p605_p3, %p599_p0 }
   0xc   :  { %609 = shalt.err (!%p606_p4)
}
   0xd   :  { %s679_s18 = smov 128   ;;  %s680_s19 = smov 8  }
   0xe   :  { %25 = dma.hbm_to_vmem [thread:$0]  %s760_s0, 256, %s20_s16, [#allocation3], %s679_s18, %s679_s18, %s680_s19  }
   0xf   :  { %s681_s22 = smov [#allocation5]  }
  0x10   :  { %s31_s23 = sshll.u32 %s681_s22, 4  ;;  %s32_s23 = int_to_ptr.vmem [resolvable:$true] %s31_s23 }
  0x11   :  { %s618_s24 = scalar_lea.vmem %s32_s23, 512  ;;  %p623_p6 = scmp.lt.s32.totalorder %s32_s23, %s32_s23 }
  0x12   :  { %p619_p5 = scmp.ne.s32.totalorder %s32_s23, %s618_s24  ;;  %p624_p7 = scmp.lt.s32.totalorder %s618_s24, %s618_s24 }
  0x14   :  { %p625_p8 = por %p624_p7, %p623_p6 }
  0x16   :  { %p626_p9 = pnand %p625_p8, %p619_p5 }
  0x18   :  { %629 = shalt.err (!%p626_p9)
}
  0x19   :  { %37 = dma.hbm_to_vmem [thread:$0]  %s761_s1, 512, %s32_s23, [#allocation6], %s679_s18, %s679_s18, %s680_s19  }
  0x1a   :  { %670 = dma.done.wait [#allocation3], 256  }
  0x1b   :  { %671 = vsyncadd [#allocation3], 4294967040 }
  0x1c   :  { %672 = dma.done.wait [#allocation6], 512  }
  0x1d   :  { %673 = vsyncadd [#allocation6], 4294966784  ;;  %vm59_vm0 = vcmask 261120   ;;  %v51_v0 = vld [vmem:[#allocation5 + $0x18] sm:$0xff]  ;;  %v50_v1 = vld [vmem:[#allocation5 + $0x10] sm:$0xff]  ;;  %v682_v6 = vmov 0.0  }
  0x1e   :  { %541 = vmatprep.subr.mxu0 %v51_v0  ;;  %v46_v2 = vld [vmem:[#allocation2] sm:$0xff]  ;;  %v49_v3 = vld [vmem:[#allocation5 + $0x8] sm:$0xff]  ;;  %v48_v4 = vld [vmem:[#allocation5] sm:$0xff]  ;;  %552 = vmatprep.subr.mxu1 %v682_v6  ;;  %vm683_vm1 = vmmov 0   ;;  %s684_s27 = smov 96   ;;  %vm299_vm2 = vcmask 64512  }
  0x1f   :  { %542 = vmatpush3.msra.mxu0 %v51_v0  ;;  %549 = vmatprep.mubr.msk.f32.mxu0 %vm59_vm0, %v46_v2  ;;  %v47_v5 = vld [vmem:[#allocation2 + $0x8] sm:$0xff]  ;;  %v518_v8 = vld [vmem:[%s762_s2] ss:$0 sm:$0xff]  ;;  %s685_s2 = smov 64   ;;  %s686_s28 = smov [#allocation8]  }
  0x20   :  { %543 = vmatprep.subr.mxu0 %v50_v1  ;;  %554 = vmatprep.mubr.msk.f32.mxu1 %vm683_vm1, %v682_v6  ;;  %s501_s29 = sshll.u32 %s686_s28, 4  ;;  %s502_s29 = int_to_ptr.vmem [resolvable:$true] %s501_s29 }
  0x21   :  { %544 = vmatpush3.msra.mxu0 %v50_v1  ;;  %s630_s30 = scalar_lea.vmem %s502_s29, 256  ;;  %p635_p11 = scmp.lt.s32.totalorder %s502_s29, %s502_s29 }
  0x22   :  { %545 = vmatprep.subr.mxu0 %v49_v3  ;;  %p631_p10 = scmp.ne.s32.totalorder %s502_s29, %s630_s30  ;;  %p636_p12 = scmp.lt.s32.totalorder %s630_s30, %s630_s30 }
  0x23   :  { %546 = vmatpush3.msra.mxu0 %v49_v3 }
  0x24   :  { %547 = vmatprep.subr.mxu0 %v48_v4  ;;  %p637_p13 = por %p636_p12, %p635_p11 }
  0x25   :  { %548 = vmatpush3.msra.mxu0 %v48_v4 }
  0x26   :  { %550 = vmatmul.mubr.msk.f32.vlgmr.msra.gmra.mxu0 %vm59_vm0, %v47_v5  ;;  %562 = vmatprep.subr.mxu0 %v682_v6  ;;  %p638_p0 = pnand %p637_p13, %p631_p10 }
  0x27   :  { %564 = vmatprep.mubr.msk.f32.mxu0 %vm683_vm1, %v682_v6 }
  0xe6   :  { %v551_v7 = vpop.f32.mrf.mxu0 }
  0xe7   :  { %v138_v11 = vadd.f32 %v551_v7, %v518_v8 }
  0xe8   :  { %v132_v9 = vpop.f32.mrf.mxu0 }
  0xe9   :  { %v133_v10 = vadd.f32 %v518_v8, %v132_v9  ;;  %v142_v15 = vmul.f32 0.17677669, %v138_v11 }
  0xeb   :  { %144 = vrot.lane.b32.xlu0 %v133_v10, %s684_s27  ;;  %v141_v13 = vmul.f32 0.17677669, %v133_v10 }
  0xef   :  { %222 = vrot.lane.b32.xlu0 %v138_v11, %s684_s27 }
 0x15d   :  { %v145_v12 = vpop.permute.xlu0 %144 }
 0x15e   :  { %553 = vmatpush3.xpose.msk.msra.mxu1 %vm59_vm0, %v145_v12 }
 0x15f   :  { %557 = vmatprep.subr.mxu1 %v682_v6 }
 0x161   :  { %v223_v14 = vpop.permute.xlu0 %222  ;;  %555 = vmatmul.mubr.msk.f32.vlgmr.msra.gmra.mxu1 %vm59_vm0, %v141_v13 }
 0x162   :  { %558 = vmatpush3.xpose.msk.msra.mxu1 %vm59_vm0, %v223_v14  ;;  %559 = vmatprep.mubr.msk.f32.mxu1 %vm683_vm1, %v682_v6 }
 0x163   :  { %567 = vmatprep.subr.mxu1 %v682_v6 }
 0x165   :  { %560 = vmatmul.mubr.msk.f32.vlgmr.msra.gmra.mxu1 %vm59_vm0, %v142_v15 }
 0x166   :  { %569 = vmatprep.mubr.msk.f32.mxu1 %vm683_vm1, %v682_v6 }
 0x221   :  { %v217_v16 = vpop.f32.mrf.mxu1 }
 0x222   :  { %v300_v17 = vsel %vm299_vm2, %v217_v16, -inf }
 0x223   :  { %301 = vmax.xlane.f32.xlu1 %v300_v17  ;;  %v556_v18 = vpop.f32.mrf.mxu1 }
 0x225   :  { %v295_v19 = vpop.f32.mrf.mxu1 }
 0x226   :  { %v303_v20 = vsel %vm299_vm2, %v295_v19, -inf }
 0x227   :  { %304 = vmax.xlane.f32.xlu1 %v303_v20  ;;  %v561_v21 = vpop.f32.mrf.mxu1 }
 0x238   :  { %328 = vrot.lane.b32.xlu1 %v133_v10, %s685_s2 }
 0x2ac   :  { %v302_v22 = vpop.xlane.xlu1 %301 }
 0x2ad   :  { %v306_v23 = vsub.f32 %v217_v16, %v302_v22 }
 0x2af   :  { %v308_v24 = vmul.f32 1.442695, %v306_v23 }
 0x2b0   :  { %v305_v25 = vpop.xlane.xlu1 %304 }
 0x2b1   :  { %582 = vpow2.f32 %v308_v24  ;;  %v307_v26 = vsub.f32 %v295_v19, %v305_v25 }
 0x2b3   :  { %v310_v27 = vmul.f32 1.442695, %v307_v26 }
 0x2b4   :  { %v329_v28 = vpop.permute.xlu1 %328 }
 0x2b5   :  { %584 = vpow2.f32 %v310_v27  ;;  %563 = vmatpush3.msra.mxu0 %v329_v28 }
 0x2be   :  { %v583_v29 = vpop.eup %582 }
 0x2bf   :  { %v312_v30 = vsel %vm299_vm2, %v583_v29, 0.0 }
 0x2c0   :  { %313 = vadd.xlane.f32.xlu0 %v312_v30 }
 0x2c2   :  { %v585_v31 = vpop.eup %584 }
 0x2c3   :  { %v315_v32 = vsel %vm299_vm2, %v585_v31, 0.0 }
 0x2c4   :  { %316 = vadd.xlane.f32.xlu1 %v315_v32 }
 0x2d5   :  { %404 = vrot.lane.b32.xlu1 %v138_v11, %s685_s2 }
 0x349   :  { %v314_v33 = vpop.xlane.xlu0 %313 }
 0x34a   :  { %586 = vrcp.f32 %v314_v33 }
 0x34d   :  { %v317_v34 = vpop.xlane.xlu1 %316 }
 0x34e   :  { %588 = vrcp.f32 %v317_v34 }
 0x351   :  { %v405_v35 = vpop.permute.xlu1 %404 }
 0x352   :  { %568 = vmatpush3.msra.mxu1 %v405_v35 }
 0x357   :  { %v587_v36 = vpop.eup %586 }
 0x358   :  { %v320_v37 = vmul.f32 %v587_v36, %v314_v33 }
 0x35a   :  { %v322_v38 = vsub.f32 2.0, %v320_v37 }
 0x35b   :  { %v589_v39 = vpop.eup %588 }
 0x35c   :  { %v324_v40 = vmul.f32 %v587_v36, %v322_v38  ;;  %v321_v41 = vmul.f32 %v589_v39, %v317_v34 }
 0x35e   :  { %v326_v42 = vmul.f32 %v583_v29, %v324_v40  ;;  %v323_v43 = vsub.f32 2.0, %v321_v41 }
 0x360   :  { %482 = vst.msk [vmem:[#allocation8] sm:$0xff] %vm299_vm2, %v326_v42  ;;  %v325_v44 = vmul.f32 %v589_v39, %v323_v43  ;;  %565 = vmatmul.mubr.msk.f32.vlgmr.msra.gmra.mxu0 %vm299_vm2, %v326_v42 }
 0x362   :  { %v327_v45 = vmul.f32 %v585_v31, %v325_v44 }
 0x364   :  { %483 = vst.msk [vmem:[#allocation8 + $0x8] sm:$0xff] %vm299_vm2, %v327_v45  ;;  %570 = vmatmul.mubr.msk.f32.vlgmr.msra.gmra.mxu1 %vm299_vm2, %v327_v45 }
 0x365   :  { %641 = shalt.err (!%p638_p0)
}
 0x366   :  { %507 = dma.vmem_to_hbm [thread:$0]  %s502_s29, 256, %s764_s4, [#allocation9], %s679_s18, %s679_s18, %s680_s19  }
 0x367   :  { %s687_s7 = smov [#allocation7]  }
 0x368   :  { %s489_s8 = sshll.u32 %s687_s7, 4  ;;  %s490_s8 = int_to_ptr.vmem [resolvable:$true] %s489_s8 }
 0x369   :  { %s650_s9 = scalar_lea.vmem %s490_s8, 256  ;;  %p655_p2 = scmp.lt.s32.totalorder %s490_s8, %s490_s8 }
 0x36a   :  { %p651_p1 = scmp.ne.s32.totalorder %s490_s8, %s650_s9  ;;  %p656_p3 = scmp.lt.s32.totalorder %s650_s9, %s650_s9 }
 0x36c   :  { %p657_p4 = por %p656_p3, %p655_p2 }
 0x36e   :  { %p658_p5 = pnand %p657_p4, %p651_p1 }
 0x420   :  { %v400_v46 = vpop.f32.mrf.mxu0 }
 0x421   :  { %480 = vst.msk [vmem:[#allocation7] sm:$0xff] %vm59_vm0, %v400_v46 }
 0x422   :  { %v566_v47 = vpop.f32.mrf.mxu0 }
 0x424   :  { %v476_v48 = vpop.f32.mrf.mxu1 }
 0x425   :  { %481 = vst.msk [vmem:[#allocation7 + $0x8] sm:$0xff] %vm59_vm0, %v476_v48 }
 0x426   :  { %v571_v49 = vpop.f32.mrf.mxu1 }
 0x427   :  { %661 = shalt.err (!%p658_p5)
}
 0x428   :  { %495 = dma.vmem_to_hbm [thread:$0]  %s490_s8, 256, %s763_s3, [#allocation4], %s679_s18, %s679_s18, %s680_s19  }
 0x429   :  { %674 = dma.done.wait [#allocation4], 256  }
 0x42a   :  { %675 = vsyncadd [#allocation4], 4294967040 }
 0x42b   :  { %676 = dma.done.wait [#allocation9], 256  }
 0x42c   :  { %677 = vsyncadd [#allocation9], 4294967040 }
 0x42d   :  { %514 = vsyncpa [#allocation3], 1 }
 0x42e   :  { %515 = vsyncpa [#allocation6], 1 }
 0x42f   :  { %516 = vsyncpa [#allocation4], 1 }
 0x430   :  { %517 = vsyncpa [#allocation9], 1 }

</bundles_post_ra>
